<compile_context>
chip_gen: v6e
topology: v6e:2x2x1
jax: 0.10.0
libtpu: 0.0.40
codegen_flags: <defaults>
</compile_context>

<pallas_src>
import jax
import jax.numpy as jnp
from jax.experimental import pallas as pl
from jax.experimental.pallas import tpu as pltpu


def _binomial_head_kernel(b_ref, x_ref, w_ref, o_ref):
    # b_ref: (1,) SMEM scalar bias
    # x_ref: (TB, D) VMEM batch tile
    # w_ref: (D, 1)  VMEM resident weight column
    # o_ref: (TB, 1) VMEM output tile
    logits = jnp.dot(x_ref[...], w_ref[...], preferred_element_type=jnp.float32)
    o_ref[...] = (logits + b_ref[0]).astype(o_ref.dtype)


def _pick_block_batch(batch, input_dim, itemsize):
    # Size TB so the double-buffered x tile (2 * TB * D * itemsize) stays within ~16 MiB.
    # This keeps the pipeline double-buffered on v5e (16 MiB default scoped VMEM),
    # v6e (128 MiB physical) and v7x (64 MiB physical) alike.
    budget = 16 * 1024 * 1024
    tb = budget // (2 * input_dim * itemsize)
    tb = max(128, min(2048, (tb // 128) * 128))
    # Never use a block much larger than the batch itself (keeps tiny test shapes exact).
    tb = min(tb, ((batch + 7) // 8) * 8)
    return max(tb, 8)


def binomial_classification_head(x, weight, bias, *, block_batch=None):
    """
    x:      (batch, input_dim)
    weight: (input_dim, 1)   (transposed vs. torch nn.Linear's (1, input_dim))
    bias:   ()               scalar
    returns (batch,) logits  == (x @ weight + bias).squeeze(-1)
    """
    B, D = x.shape
    assert weight.shape == (D, 1), weight.shape

    if block_batch is None:
        block_batch = _pick_block_batch(B, D, jnp.dtype(x.dtype).itemsize)
    # TODO(synk): if D were so large that even an (8, D) double-buffered tile exceeds VMEM,
    # a K-reduction grid axis would be required; classification-head input dims never hit this.

    bias_arr = jnp.reshape(bias, (1,)).astype(jnp.float32)

    isize = jnp.dtype(x.dtype).itemsize
    cost = pl.CostEstimate(
        flops=2 * B * D,
        transcendentals=0,
        bytes_accessed=isize * (B * D + D + B) + 4,
    )

    out = pl.pallas_call(
        _binomial_head_kernel,
        out_shape=jax.ShapeDtypeStruct((B, 1), x.dtype),
        grid_spec=pl.GridSpec(
            grid=(pl.cdiv(B, block_batch),),
            in_specs=[
                pl.BlockSpec(memory_space=pltpu.SMEM),              # bias scalar (SMEM)
                pl.BlockSpec((block_batch, D), lambda i: (i, 0)),   # x batch tile (streamed)
                pl.BlockSpec((D, 1), lambda i: (0, 0)),             # weight (resident)
            ],
            out_specs=pl.BlockSpec((block_batch, 1), lambda i: (i, 0)),
        ),
        compiler_params=pltpu.CompilerParams(
            dimension_semantics=("parallel",),          # shard batch tiles across TCs on v7x
            vmem_limit_bytes=48 * 1024 * 1024,          # above 16/32 MiB defaults, < v7x physical
        ),
        cost_estimate=cost,
    )(bias_arr, x, weight)

    return out[:, 0]  # .squeeze(-1)


if __name__ == "__main__":
    key = jax.random.PRNGKey(0)
    k_x, k_w, k_b, k_x2 = jax.random.split(key, 4)

    batch, input_dim = 8, 32

    # Deterministic parameter init mirroring nn.Linear: U(-1/sqrt(D), 1/sqrt(D))
    bound = 1.0 / jnp.sqrt(jnp.float32(input_dim))
    weight = jax.random.uniform(k_w, (input_dim, 1), jnp.float32, -bound, bound)
    bias = jax.random.uniform(k_b, (), jnp.float32, -bound, bound)

    # Test 1: small shape matching the module's typical head usage (single tile).
    x = jax.random.normal(k_x, (batch, input_dim), jnp.float32)
    logits = binomial_classification_head(x, weight, bias)
    jax.block_until_ready(logits)
    ref = (x @ weight)[:, 0] + bias
    assert logits.shape == (batch,)
    assert jnp.allclose(logits, ref, atol=1e-5, rtol=1e-5)

    # Test 2: multi-tile grid with a partial tail block (exercises the tiled/masked path).
    batch2 = 40
    x2 = jax.random.normal(k_x2, (batch2, input_dim), jnp.float32)
    logits2 = binomial_classification_head(x2, weight, bias, block_batch=16)
    jax.block_until_ready(logits2)
    ref2 = (x2 @ weight)[:, 0] + bias
    assert logits2.shape == (batch2,)
    assert jnp.allclose(logits2, ref2, atol=1e-5, rtol=1e-5)

    print("KERNEL_OK")
</pallas_src>

<mosaic_0001>
module attributes {stable_mosaic.version = 11 : i64} {
  func.func @_binomial_head_kernel(%arg0: i32, %arg1: memref<1xf32, #tpu.memory_space<smem>>, %arg2: memref<8x32xf32, #tpu.memory_space<vmem>>, %arg3: memref<32x1xf32, #tpu.memory_space<vmem>>, %arg4: memref<8x1xf32, #tpu.memory_space<vmem>>) attributes {dimension_semantics = [#tpu.dimension_semantics<parallel>], iteration_bounds = array<i64: 1>, scalar_prefetch = 0 : i64, scratch_operands = 0 : i64, tpu.core_type = #tpu.core_type<tc>, window_params = [{transform_indices = @transform_0, window_bounds = array<i64: 1>}, {transform_indices = @transform_1, window_bounds = array<i64: 8, 32>}, {pipeline_mode = #tpu.pipeline_mode<synchronous>, transform_indices = @transform_2, window_bounds = array<i64: 32, 1>}, {transform_indices = @transform_3, window_bounds = array<i64: 8, 1>}]} {
    %c0 = arith.constant 0 : index
    %c0_0 = arith.constant 0 : index
    %0 = vector.load %arg2[%c0, %c0_0] : memref<8x32xf32, #tpu.memory_space<vmem>>, vector<8x32xf32>
    %c0_1 = arith.constant 0 : index
    %c0_2 = arith.constant 0 : index
    %1 = vector.load %arg3[%c0_1, %c0_2] : memref<32x1xf32, #tpu.memory_space<vmem>>, vector<32x1xf32>
    %cst = arith.constant dense<0.000000e+00> : vector<8x1xf32>
    %2 = tpu.matmul %0, %1, %cst {dimension_numbers = #tpu.dot_dimension_numbers<[1], [0], [0], [1], [0, 0, 1, 1], [], []>} : vector<8x32xf32>, vector<32x1xf32>, vector<8x1xf32> -> vector<8x1xf32>
    %c0_3 = arith.constant 0 : index
    %3 = memref.load %arg1[%c0_3] : memref<1xf32, #tpu.memory_space<smem>>
    %4 = vector.broadcast %3 : f32 to vector<8x1xf32>
    %5 = arith.addf %2, %4 : vector<8x1xf32>
    %c0_4 = arith.constant 0 : index
    %c0_5 = arith.constant 0 : index
    %6 = vector.load %arg4[%c0_4, %c0_5] : memref<8x1xf32, #tpu.memory_space<vmem>>, vector<8x1xf32>
    tpu.vector_store %arg4[%c0_4, %c0_5], %5 {strides = array<i32>} : memref<8x1xf32, #tpu.memory_space<vmem>>, vector<8x1xf32>,
    return
  }
  func.func @transform_0(%arg0: i32) -> i32 {
    %c0_i32 = arith.constant 0 : i32
    %c0_i32_0 = arith.constant 0 : i32
    return %c0_i32 : i32
  }
  func.func @transform_1(%arg0: i32) -> (i32, i32) {
    %c0_i32 = arith.constant 0 : i32
    %c0_i32_0 = arith.constant 0 : i32
    return %arg0, %c0_i32 : i32, i32
  }
  func.func @transform_2(%arg0: i32) -> (i32, i32) {
    %c0_i32 = arith.constant 0 : i32
    %c0_i32_0 = arith.constant 0 : i32
    %c0_i32_1 = arith.constant 0 : i32
    return %c0_i32, %c0_i32_0 : i32, i32
  }
  func.func @transform_3(%arg0: i32) -> (i32, i32) {
    %c0_i32 = arith.constant 0 : i32
    %c0_i32_0 = arith.constant 0 : i32
    return %arg0, %c0_i32 : i32, i32
  }
}

</mosaic_0001>

<bundles_post_ra>
// kernel: tpu_custom_call.1
= control target key start
LH: loop header
LB: loop body
LE: loop exit
PB: predicated region body
PF: predicated region fallthrough
CT: control target
= control target key end

     0   :  { %v121_v0 = vmov 0.0   ;;  %vm122_vm0 = vmmov 0   ;;  %vm22_vm1 = vcmask 261120   ;;  %vm96_vm2 = vcmask 7168   ;;  %s164_s2 = inlined_call_operand.vmem [shape: f32[32,1], index: 2, kind: input, shape index: {}]   ;;  %s165_s1 = inlined_call_operand.vmem [shape: f32[8,32], index: 1, kind: input, shape index: {}]   ;;  %s166_s0 = inlined_call_operand.<no memory space> [shape: f32[1], index: 0, kind: input, shape index: {}]   ;;  %s167_s3 = inlined_call_operand.vmem [shape: f32[8,1], index: 3, kind: output, shape index: {}]  }
   0x1   :  { %108 = vmatprep.subr.mxu0 %v121_v0  ;;  %v19_v1 = vld [vmem:[%s164_s2 + $0x18] sm:$0xff]  ;;  %v18_v2 = vld [vmem:[%s164_s2 + $0x10] sm:$0xff]  ;;  %116 = vmatprep.mubr.msk.f32.mxu0 %vm122_vm0, %v121_v0  ;;  %v17_v3 = vld [vmem:[%s164_s2 + $0x8] sm:$0xff]  ;;  %v21_v6 = vstv %s166_s0 }
   0x2   :  { %109 = vmatpush3.msra.mxu0 %v19_v1  ;;  %v16_v4 = vld [vmem:[%s164_s2] sm:$0xff] }
   0x3   :  { %110 = vmatprep.subr.mxu0 %v121_v0  ;;  %v15_v5 = vld [vmem:[%s165_s1] sm:$0xff] }
   0x4   :  { %111 = vmatpush3.msra.mxu0 %v18_v2 }
   0x5   :  { %112 = vmatprep.subr.mxu0 %v121_v0 }
   0x6   :  { %113 = vmatpush3.msra.mxu0 %v17_v3 }
   0x7   :  { %114 = vmatprep.subr.mxu0 %v121_v0 }
   0x8   :  { %115 = vmatpush3.msra.mxu0 %v16_v4 }
   0x9   :  { %117 = vmatmul.mubr.msk.f32.vlgmr.msra.gmra.mxu0 %vm22_vm1, %v15_v5 }
  0xc9   :  { %v92_v7 = vpop.f32.mrf.mxu0 }
  0xca   :  { %v93_v8 = vadd.f32 %v92_v7, %v21_v6 }
  0xcb   :  { %v118_v9 = vpop.f32.mrf.mxu0 }
  0xcc   :  { %97 = vst.msk [vmem:[%s167_s3] sm:$0xff] %vm96_vm2, %v93_v8 }

</bundles_post_ra>
